<compile_context>
chip_gen: v6e
topology: v6e:2x2x1
jax: 0.10.0
libtpu: 0.0.40
codegen_flags: <defaults>
</compile_context>

<pallas_src>
import jax
import jax.numpy as jnp
from jax.experimental import pallas as pl
from jax.experimental.pallas import tpu as pltpu

IN_FEATURES = 3 * 19 + 18   # 75
D_MODEL = 512


def _linear_relu_kernel(x_ref, w_ref, b_ref, o_ref):
    # x_ref: (tm, 75)  w_ref: (75, d_model)  b_ref: (1, d_model)  o_ref: (tm, d_model)
    x = x_ref[...].astype(w_ref.dtype)          # bf16 fast path: cast on VPU
    acc = jnp.dot(x, w_ref[...], preferred_element_type=jnp.float32)
    o_ref[...] = jnp.maximum(acc + b_ref[...], 0.0).astype(o_ref.dtype)


def prepare_params(w, b, param_dtype=jnp.bfloat16):
    """One-time parameter prep.

    w: (d_model, 75) PyTorch nn.Linear layout, b: (d_model,).
    Returns (w_t: (75, d_model) in param_dtype, b2d: (1, d_model) f32).
    """
    d_model = w.shape[0]
    w_t = w.T.astype(param_dtype)                 # (75, d_model), unpadded
    b2d = b.reshape(1, d_model).astype(jnp.float32)
    return w_t, b2d


def _round_up(n, m):
    return ((n + m - 1) // m) * m


def _num_tensorcores_per_chip():
    # Only v7x has 2 TensorCores per chip; on v5e/v6e the grid is a serial loop.
    try:
        kind = (getattr(jax.devices()[0], "device_kind", "") or "").lower()
        if "v7" in kind:
            return 2
    except Exception:
        pass
    return 1


def _pick_tm(batch, tm_max=2048):
    """Row tile: as big as possible (amortize ~0.35us/step).  Only on multi-TC
    chips (v7x) do we force >=2 grid steps so dimension_semantics=("parallel",)
    can shard the grid across both TensorCores."""
    bp = _round_up(batch, 8)
    if _num_tensorcores_per_chip() >= 2 and bp > 128:
        return min(tm_max, _round_up(pl.cdiv(bp, 2), 128))
    return min(bp, tm_max)


def anthro_joint_embedding(x, w_t, b2d, *, tm=None, out_dtype=jnp.bfloat16):
    """x: (B, 75) float32/bfloat16, w_t: (75, d_model), b2d: (1, d_model) f32.

    Default path writes bf16 (f32 accumulation inside the MXU); pass
    out_dtype=jnp.float32 (and f32 w_t) for strict numerics.
    """
    B, F = x.shape
    assert F == IN_FEATURES
    kf, d_model = w_t.shape
    assert kf == IN_FEATURES
    if tm is None:
        tm = _pick_tm(B)

    grid = (pl.cdiv(B, tm),)

    cost = pl.CostEstimate(
        flops=2 * B * IN_FEATURES * d_model,
        transcendentals=0,
        bytes_accessed=(x.size * x.dtype.itemsize
                        + w_t.size * w_t.dtype.itemsize
                        + b2d.size * b2d.dtype.itemsize
                        + B * d_model * jnp.dtype(out_dtype).itemsize),
    )

    return pl.pallas_call(
        _linear_relu_kernel,
        out_shape=jax.ShapeDtypeStruct((B, d_model), out_dtype),
        grid_spec=pltpu.PrefetchScalarGridSpec(
            num_scalar_prefetch=0,
            grid=grid,
            in_specs=[
                # Last block dim equals the full array dim (75): legal & unpadded.
                pl.BlockSpec((tm, IN_FEATURES), lambda i: (i, 0)),
                pl.BlockSpec((IN_FEATURES, d_model), lambda i: (0, 0)),
                pl.BlockSpec((1, d_model), lambda i: (0, 0)),
            ],
            out_specs=pl.BlockSpec((tm, d_model), lambda i: (i, 0)),
        ),
        compiler_params=pltpu.CompilerParams(
            dimension_semantics=("parallel",),
        ),
        cost_estimate=cost,
    )(x, w_t, b2d)


def init_params(key, d_model=D_MODEL):
    # Match PyTorch nn.Linear default init: U(-1/sqrt(fan_in), 1/sqrt(fan_in)).
    k_w, k_b = jax.random.split(key)
    bound = 1.0 / jnp.sqrt(jnp.float32(IN_FEATURES))
    w = jax.random.uniform(k_w, (d_model, IN_FEATURES), jnp.float32, -bound, bound)
    b = jax.random.uniform(k_b, (d_model,), jnp.float32, -bound, bound)
    return w, b


if __name__ == "__main__":
    key = jax.random.PRNGKey(0)
    k_x1, k_x2, k_p = jax.random.split(key, 3)

    w, b = init_params(k_p, D_MODEL)

    # --- Default fast path: bf16 weights, bf16 output, f32 accumulation. ---
    # Ragged multi-tile-capable batch (300 rows) exercises the cdiv grid +
    # masked last block.
    w_bf16, b2d = prepare_params(w, b, param_dtype=jnp.bfloat16)
    x = jax.random.normal(k_x1, (300, IN_FEATURES), jnp.float32)
    y = jax.block_until_ready(anthro_joint_embedding(x, w_bf16, b2d))

    y_ref = jnp.maximum(x @ w.T + b, 0.0)
    assert y.shape == (300, D_MODEL)
    assert y.dtype == jnp.bfloat16
    assert jnp.allclose(y.astype(jnp.float32), y_ref, atol=5e-2, rtol=5e-2), \
        "bf16 fast path mismatch vs reference"

    # --- Strict-numerics opt-in: f32 weights and f32 output. ---
    w_f32, b2d_f32 = prepare_params(w, b, param_dtype=jnp.float32)
    x2 = jax.random.normal(k_x2, (8, IN_FEATURES), jnp.float32)
    y2 = jax.block_until_ready(
        anthro_joint_embedding(x2, w_f32, b2d_f32, out_dtype=jnp.float32))

    y2_ref = jnp.maximum(x2 @ w.T + b, 0.0)
    assert y2.shape == (8, D_MODEL)
    assert jnp.allclose(y2, y2_ref, atol=1e-4, rtol=1e-4), \
        "f32 strict path mismatch vs reference"

    print("KERNEL_OK")
</pallas_src>

<mosaic_0001>
module attributes {stable_mosaic.version = 11 : i64} {
  func.func @_linear_relu_kernel(%arg0: i32, %arg1: memref<304x75xf32, #tpu.memory_space<vmem>>, %arg2: memref<75x512xbf16, #tpu.memory_space<vmem>>, %arg3: memref<1x512xf32, #tpu.memory_space<vmem>>, %arg4: memref<304x512xbf16, #tpu.memory_space<vmem>>) attributes {dimension_semantics = [#tpu.dimension_semantics<parallel>], iteration_bounds = array<i64: 1>, scalar_prefetch = 0 : i64, scratch_operands = 0 : i64, tpu.core_type = #tpu.core_type<tc>, window_params = [{transform_indices = @transform_0, window_bounds = array<i64: 304, 75>}, {pipeline_mode = #tpu.pipeline_mode<synchronous>, transform_indices = @transform_1, window_bounds = array<i64: 75, 512>}, {pipeline_mode = #tpu.pipeline_mode<synchronous>, transform_indices = @transform_2, window_bounds = array<i64: 1, 512>}, {transform_indices = @transform_3, window_bounds = array<i64: 304, 512>}]} {
    %c0 = arith.constant 0 : index
    %c0_0 = arith.constant 0 : index
    %0 = vector.load %arg1[%c0, %c0_0] : memref<304x75xf32, #tpu.memory_space<vmem>>, vector<304x75xf32>
    %1 = arith.truncf %0 : vector<304x75xf32> to vector<304x75xbf16>
    %c0_1 = arith.constant 0 : index
    %c0_2 = arith.constant 0 : index
    %2 = vector.load %arg2[%c0_1, %c0_2] : memref<75x512xbf16, #tpu.memory_space<vmem>>, vector<75x512xbf16>
    %cst = arith.constant dense<0.000000e+00> : vector<304x512xf32>
    %3 = tpu.matmul %1, %2, %cst {dimension_numbers = #tpu.dot_dimension_numbers<[1], [0], [0], [1], [0, 0, 1, 1], [], []>} : vector<304x75xbf16>, vector<75x512xbf16>, vector<304x512xf32> -> vector<304x512xf32>
    %c0_3 = arith.constant 0 : index
    %c0_4 = arith.constant 0 : index
    %4 = vector.load %arg3[%c0_3, %c0_4] : memref<1x512xf32, #tpu.memory_space<vmem>>, vector<1x512xf32>
    %5 = vector.broadcast %4 : vector<1x512xf32> to vector<304x512xf32>
    %6 = arith.addf %3, %5 : vector<304x512xf32>
    %cst_5 = arith.constant 0.000000e+00 : f32
    %7 = vector.broadcast %cst_5 : f32 to vector<304x512xf32>
    %8 = arith.maximumf %6, %7 : vector<304x512xf32>
    %9 = arith.truncf %8 : vector<304x512xf32> to vector<304x512xbf16>
    %c0_6 = arith.constant 0 : index
    %c0_7 = arith.constant 0 : index
    %10 = vector.load %arg4[%c0_6, %c0_7] : memref<304x512xbf16, #tpu.memory_space<vmem>>, vector<304x512xbf16>
    tpu.vector_store %arg4[%c0_6, %c0_7], %9 {strides = array<i32>} : memref<304x512xbf16, #tpu.memory_space<vmem>>, vector<304x512xbf16>,
    return
  }
  func.func @transform_0(%arg0: i32) -> (i32, i32) {
    %c0_i32 = arith.constant 0 : i32
    %c0_i32_0 = arith.constant 0 : i32
    return %arg0, %c0_i32 : i32, i32
  }
  func.func @transform_1(%arg0: i32) -> (i32, i32) {
    %c0_i32 = arith.constant 0 : i32
    %c0_i32_0 = arith.constant 0 : i32
    %c0_i32_1 = arith.constant 0 : i32
    return %c0_i32, %c0_i32_0 : i32, i32
  }
  func.func @transform_2(%arg0: i32) -> (i32, i32) {
    %c0_i32 = arith.constant 0 : i32
    %c0_i32_0 = arith.constant 0 : i32
    %c0_i32_1 = arith.constant 0 : i32
    return %c0_i32, %c0_i32_0 : i32, i32
  }
  func.func @transform_3(%arg0: i32) -> (i32, i32) {
    %c0_i32 = arith.constant 0 : i32
    %c0_i32_0 = arith.constant 0 : i32
    return %arg0, %c0_i32 : i32, i32
  }
}

</mosaic_0001>

<bundles_post_ra>
// kernel: tpu_custom_call.1
= control target key start
LH: loop header
LB: loop body
LE: loop exit
PB: predicated region body
PF: predicated region fallthrough
CT: control target
= control target key end

     0   :  { %vm269_vm0 = vcmask 1044480   ;;  %vm270_vm1 = vcmask 1045504   ;;  %v1698_v1 = vmov 65535   ;;  %v1699_v12 = vmov 0   ;;  %s2139_s0 = inlined_call_operand.vmem [shape: f32[300,75], index: 0, kind: input, shape index: {}]   ;;  %s2140_s1 = inlined_call_operand.vmem [shape: bf16[75,512], index: 1, kind: input, shape index: {}]   ;;  %s2141_s2 = inlined_call_operand.vmem [shape: f32[1,512], index: 2, kind: input, shape index: {}]   ;;  %s2142_s3 = inlined_call_operand.hbm [shape: bf16[300,512], index: 3, kind: output, shape index: {}]  }
   0x1   :  { %v1646_v0 = vld [vmem:[%s2140_s1 + $0x84] ss:$16 sps:$4 sm:$0x3f]   ;;  %v271_v2 = vsel %vm269_vm0, 4294967295, %v1698_v1  ;;  %v1654_v11 = vld [vmem:[%s2140_s1 + $0x6c] ss:$16 sps:$4 sm:$0xff]   ;;  %317 = vmatprep.mubr.bf16.mxu0 %v1699_v12  ;;  %540 = vmatprep.mubr.bf16.mxu1 %v1699_v12 }
   0x2   :  { %v1648_v3 = vld [vmem:[%s2140_s1 + $0x8c] ss:$16 sps:$4 sm:$0x3f]   ;;  %v272_v4 = vsel %vm270_vm1, %v271_v2, 0  ;;  %v1652_v6 = vld [vmem:[%s2140_s1 + $0x64] ss:$16 sps:$4 sm:$0xff]  }
   0x3   :  { %v1650_v5 = vld [vmem:[%s2140_s1 + $0x80] ss:$16 sps:$4 sm:$0x3f]   ;;  %v277_v7 = vand.u32 %v1646_v0, %v272_v4  ;;  %v283_v8 = vand.u32 %v1648_v3, %v272_v4  ;;  %v1651_v9 = vld [vmem:[%s2140_s1 + $0x88] ss:$16 sps:$4 sm:$0x3f]  }
   0x4   :  { %v274_v10 = vand.u32 %v1650_v5, %v272_v4  ;;  %v280_v13 = vand.u32 %v1651_v9, %v272_v4  ;;  %v1656_v14 = vld [vmem:[%s2140_s1 + $0x60] ss:$16 sps:$4 sm:$0xff]   ;;  %v1657_v15 = vld [vmem:[%s2140_s1 + $0x68] ss:$16 sps:$4 sm:$0xff]   ;;  %v1658_v16 = vld [vmem:[%s2140_s1 + $0x44] ss:$16 sps:$4 sm:$0xff]  }
   0x5   :  { %291 = vmatprep.subr.bf16.mxu0 %v277_v7  ;;  %514 = vmatprep.subr.bf16.mxu1 %v283_v8  ;;  %v1660_v17 = vld [vmem:[%s2140_s1 + $0x4c] ss:$16 sps:$4 sm:$0xff]   ;;  %v1662_v18 = vld [vmem:[%s2140_s1 + $0x40] ss:$16 sps:$4 sm:$0xff]   ;;  %v1663_v19 = vld [vmem:[%s2140_s1 + $0x48] ss:$16 sps:$4 sm:$0xff]  }
   0x6   :  { %292 = vmatpush1.bf16.msra.mxu0 %v274_v10  ;;  %515 = vmatpush1.bf16.msra.mxu1 %v280_v13  ;;  %v1664_v20 = vld [vmem:[%s2140_s1 + $0x24] ss:$16 sps:$4 sm:$0xff]   ;;  %v1666_v21 = vld [vmem:[%s2140_s1 + $0x2c] ss:$16 sps:$4 sm:$0xff]   ;;  %v1668_v22 = vld [vmem:[%s2140_s1 + $0x20] ss:$16 sps:$4 sm:$0xff]  }
   0x7   :  { %293 = vmatprep.subr.bf16.mxu0 %v1652_v6  ;;  %516 = vmatprep.subr.bf16.mxu1 %v1654_v11  ;;  %v1669_v23 = vld [vmem:[%s2140_s1 + $0x28] ss:$16 sps:$4 sm:$0xff]   ;;  %v1670_v24 = vld [vmem:[%s2140_s1 + $0x4] ss:$16 sps:$4 sm:$0xff]   ;;  %v1672_v25 = vld [vmem:[%s2140_s1 + $0xc] ss:$16 sps:$4 sm:$0xff]  }
   0x8   :  { %v1674_v26 = vld [vmem:[%s2140_s1] ss:$16 sps:$4 sm:$0xff]   ;;  %v17_v28 = vld [vmem:[%s2139_s0 + $0x8] sm:$0xff]  ;;  %vm211_vm2 = vcmask 613376  }
   0x9   :  { %v16_v27 = vld [vmem:[%s2139_s0] sm:$0xff]  ;;  %v1675_v29 = vld [vmem:[%s2140_s1 + $0x8] ss:$16 sps:$4 sm:$0xff]  }
   0xa   :  { %294 = vmatpush1.bf16.msra.mxu0 %v1656_v14  ;;  %517 = vmatpush1.bf16.msra.mxu1 %v1657_v15  ;;  %v54_v30 = vpack.c.bf16 %v17_v28, %v16_v27 }
   0xb   :  { %295 = vmatprep.subr.bf16.mxu0 %v1658_v16  ;;  %518 = vmatprep.subr.bf16.mxu1 %v1660_v17 }
   0xe   :  { %296 = vmatpush1.bf16.msra.mxu0 %v1662_v18  ;;  %519 = vmatpush1.bf16.msra.mxu1 %v1663_v19 }
   0xf   :  { %297 = vmatprep.subr.bf16.mxu0 %v1664_v20  ;;  %520 = vmatprep.subr.bf16.mxu1 %v1666_v21 }
  0x12   :  { %298 = vmatpush1.bf16.msra.mxu0 %v1668_v22  ;;  %521 = vmatpush1.bf16.msra.mxu1 %v1669_v23 }
  0x13   :  { %299 = vmatprep.subr.bf16.mxu0 %v1670_v24  ;;  %522 = vmatprep.subr.bf16.mxu1 %v1672_v25 }
  0x16   :  { %300 = vmatpush1.bf16.msra.mxu0 %v1674_v26  ;;  %523 = vmatpush1.bf16.msra.mxu1 %v1675_v29 }
  0x17   :  { %8 = vsyncpa [#allocation3], 0  ;;  %v18_v31 = vld [vmem:[%s2139_s0 + $0x10] sm:$0xff]  ;;  %v19_v32 = vld [vmem:[%s2139_s0 + $0x18] sm:$0xff]  ;;  %v95_v22 = vlaneseq }
  0x18   :  { %v55_v33 = vpack.c.bf16 %v19_v32, %v18_v31  ;;  %v20_v34 = vld [vmem:[%s2139_s0 + $0x20] sm:$0xff]  ;;  %v21_v35 = vld [vmem:[%s2139_s0 + $0x28] sm:$0xff]  ;;  %v22_v37 = vld [vmem:[%s2139_s0 + $0x30] sm:$0xff] }
  0x19   :  { %1451 = vmatmul.mubr.msk.bf16.vlgmr.msra.gmra.mxu0 %vm211_vm2, %v54_v30  ;;  %1470 = vmatmul.mubr.msk.bf16.vlgmr.msra.gmra.mxu1 %vm211_vm2, %v54_v30  ;;  %v56_v36 = vpack.c.bf16 %v21_v35, %v20_v34  ;;  %v23_v38 = vld [vmem:[%s2139_s0 + $0x38] sm:$0xff]  ;;  %v24_v40 = vld [vmem:[%s2139_s0 + $0x40] sm:$0xff]  ;;  %v25_v41 = vld [vmem:[%s2139_s0 + $0x48] sm:$0xff]  ;;  %v96_v23 = vshrl.u32 %v95_v22, 7 }
  0x1a   :  { %327 = vmatprep.mubr.bf16.mxu0 %v1699_v12  ;;  %550 = vmatprep.mubr.bf16.mxu1 %v1699_v12  ;;  %v57_v39 = vpack.c.bf16 %v23_v38, %v22_v37  ;;  %v58_v42 = vpack.c.bf16 %v25_v41, %v24_v40  ;;  %v26_v43 = vld [vmem:[%s2139_s0 + $0x50] sm:$0xff]  ;;  %v27_v44 = vld [vmem:[%s2139_s0 + $0x58] sm:$0xff]  ;;  %v28_v46 = vld [vmem:[%s2139_s0 + $0x60] sm:$0xff] }
  0x1b   :  { %v59_v45 = vpack.c.bf16 %v27_v44, %v26_v43  ;;  %v29_v47 = vld [vmem:[%s2139_s0 + $0x68] sm:$0xff]  ;;  %v30_v49 = vld [vmem:[%s2139_s0 + $0x70] sm:$0xff]  ;;  %v31_v50 = vld [vmem:[%s2139_s0 + $0x78] sm:$0xff]  ;;  %v97_v24 = vsub.s32 0, %v96_v23  ;;  %v105_v26 = vsub.s32 2, %v96_v23  ;;  %v101_v27 = vsub.s32 1, %v96_v23 }
  0x1c   :  { %v60_v48 = vpack.c.bf16 %v29_v47, %v28_v46  ;;  %v61_v51 = vpack.c.bf16 %v31_v50, %v30_v49  ;;  %v32_v52 = vld [vmem:[%s2139_s0 + $0x80] sm:$0xff]  ;;  %v33_v53 = vld [vmem:[%s2139_s0 + $0x88] sm:$0xff]  ;;  %v34_v55 = vld [vmem:[%s2139_s0 + $0x90] sm:$0xff]  ;;  %v109_v28 = vsub.s32 3, %v96_v23 }
  0x1d   :  { %v62_v54 = vpack.c.bf16 %v33_v53, %v32_v52  ;;  %v35_v56 = vld [vmem:[%s2139_s0 + $0x98] sm:$0xff]  ;;  %v36_v58 = vld [vmem:[%s2139_s0 + $0xa0] sm:$0xff]  ;;  %v37_v59 = vld [vmem:[%s2139_s0 + $0xa8] sm:$0xff] }
  0x1e   :  { %v63_v57 = vpack.c.bf16 %v35_v56, %v34_v55  ;;  %v64_v60 = vpack.c.bf16 %v37_v59, %v36_v58  ;;  %v38_v61 = vld [vmem:[%s2139_s0 + $0xb0] sm:$0xff]  ;;  %v39_v62 = vld [vmem:[%s2139_s0 + $0xb8] sm:$0xff]  ;;  %v40_v0 = vld [vmem:[%s2139_s0 + $0xc0] sm:$0xff] }
  0x1f   :  { %v65_v63 = vpack.c.bf16 %v39_v62, %v38_v61  ;;  %v41_v1 = vld [vmem:[%s2139_s0 + $0xc8] sm:$0xff]  ;;  %v42_v3 = vld [vmem:[%s2139_s0 + $0xd0] sm:$0xff]  ;;  %v43_v4 = vld [vmem:[%s2139_s0 + $0xd8] sm:$0xff] }
  0x20   :  { %v66_v2 = vpack.c.bf16 %v41_v1, %v40_v0  ;;  %v67_v5 = vpack.c.bf16 %v43_v4, %v42_v3  ;;  %v44_v6 = vld [vmem:[%s2139_s0 + $0xe0] sm:$0xff]  ;;  %v45_v7 = vld [vmem:[%s2139_s0 + $0xe8] sm:$0xff]  ;;  %v46_v9 = vld [vmem:[%s2139_s0 + $0xf0] sm:$0xff] }
  0x21   :  { %1452 = vmatmul.mubr.msk.bf16.gmra.mxu0 %vm211_vm2, %v55_v33  ;;  %1471 = vmatmul.mubr.msk.bf16.gmra.mxu1 %vm211_vm2, %v55_v33  ;;  %v68_v8 = vpack.c.bf16 %v45_v7, %v44_v6  ;;  %v47_v10 = vld [vmem:[%s2139_s0 + $0xf8] sm:$0xff]  ;;  %v48_v13 = vld [vmem:[%s2139_s0 + $0x100] sm:$0xff]  ;;  %v49_v14 = vld [vmem:[%s2139_s0 + $0x108] sm:$0xff] }
  0x22   :  { %337 = vmatprep.mubr.bf16.mxu0 %v1699_v12  ;;  %560 = vmatprep.mubr.bf16.mxu1 %v1699_v12  ;;  %v69_v11 = vpack.c.bf16 %v47_v10, %v46_v9  ;;  %v70_v15 = vpack.c.bf16 %v49_v14, %v48_v13  ;;  %v50_v16 = vld [vmem:[%s2139_s0 + $0x110] sm:$0xff]  ;;  %v51_v17 = vld [vmem:[%s2139_s0 + $0x118] sm:$0xff]  ;;  %v52_v19 = vld [vmem:[%s2139_s0 + $0x120] sm:$0xff] }
  0x23   :  { %v71_v18 = vpack.c.bf16 %v51_v17, %v50_v16  ;;  %v53_v20 = vld [vmem:[%s2139_s0 + $0x128] sm:$0xff]  ;;  %v93_v25 = vld [vmem:[%s2141_s2] sm:$0xf]  ;;  %s1700_s0 = smov [#allocation2]  }
  0x24   :  { %v72_v21 = vpack.c.bf16 %v53_v20, %v52_v19  ;;  %v1976_v29 = vrot.slane %v93_v25, %v97_v24  ;;  %v1978_v30 = vrot.slane %v93_v25, %v105_v26  ;;  %v1982_v32 = vrot.slane %v93_v25, %v109_v28  ;;  %s1420_s2 = sshll.u32 %s1700_s0, 4  ;;  %s1421_s2 = int_to_ptr.vmem [resolvable:$true] %s1420_s2 }
  0x25   :  { %s1676_s19 = scalar_lea.vmem %s1421_s2, 9728  ;;  %p1681_p1 = scmp.lt.s32.totalorder %s1421_s2, %s1421_s2 }
  0x26   :  { %p1677_p0 = scmp.ne.s32.totalorder %s1421_s2, %s1676_s19  ;;  %p1682_p2 = scmp.lt.s32.totalorder %s1676_s19, %s1676_s19 }
  0x28   :  { %p1683_p3 = por %p1682_p2, %p1681_p1 }
  0x29   :  { %1453 = vmatmul.mubr.msk.bf16.gmra.mxu0 %vm211_vm2, %v56_v36  ;;  %1472 = vmatmul.mubr.msk.bf16.gmra.mxu1 %vm211_vm2, %v56_v36 }
  0x2a   :  { %347 = vmatprep.mubr.bf16.mxu0 %v1699_v12  ;;  %570 = vmatprep.mubr.bf16.mxu1 %v1699_v12  ;;  %p1684_p4 = pnand %p1683_p3, %p1677_p0 }
  0x31   :  { %1454 = vmatmul.mubr.msk.bf16.gmra.mxu0 %vm211_vm2, %v57_v39  ;;  %1473 = vmatmul.mubr.msk.bf16.gmra.mxu1 %vm211_vm2, %v57_v39 }
  0x32   :  { %357 = vmatprep.mubr.bf16.mxu0 %v1699_v12  ;;  %580 = vmatprep.mubr.bf16.mxu1 %v1699_v12 }
  0x39   :  { %1455 = vmatmul.mubr.msk.bf16.gmra.mxu0 %vm211_vm2, %v58_v42  ;;  %1474 = vmatmul.mubr.msk.bf16.gmra.mxu1 %vm211_vm2, %v58_v42 }
  0x3a   :  { %367 = vmatprep.mubr.bf16.mxu0 %v1699_v12  ;;  %590 = vmatprep.mubr.bf16.mxu1 %v1699_v12 }
  0x41   :  { %1456 = vmatmul.mubr.msk.bf16.gmra.mxu0 %vm211_vm2, %v59_v45  ;;  %1475 = vmatmul.mubr.msk.bf16.gmra.mxu1 %vm211_vm2, %v59_v45 }
  0x42   :  { %377 = vmatprep.mubr.bf16.mxu0 %v1699_v12  ;;  %600 = vmatprep.mubr.bf16.mxu1 %v1699_v12 }
  0x49   :  { %1457 = vmatmul.mubr.msk.bf16.gmra.mxu0 %vm211_vm2, %v60_v48  ;;  %1476 = vmatmul.mubr.msk.bf16.gmra.mxu1 %vm211_vm2, %v60_v48 }
  0x4a   :  { %387 = vmatprep.mubr.bf16.mxu0 %v1699_v12  ;;  %610 = vmatprep.mubr.bf16.mxu1 %v1699_v12 }
  0x51   :  { %1458 = vmatmul.mubr.msk.bf16.gmra.mxu0 %vm211_vm2, %v61_v51  ;;  %1477 = vmatmul.mubr.msk.bf16.gmra.mxu1 %vm211_vm2, %v61_v51 }
  0x52   :  { %397 = vmatprep.mubr.bf16.mxu0 %v1699_v12  ;;  %620 = vmatprep.mubr.bf16.mxu1 %v1699_v12 }
  0x59   :  { %1459 = vmatmul.mubr.msk.bf16.gmra.mxu0 %vm211_vm2, %v62_v54  ;;  %1478 = vmatmul.mubr.msk.bf16.gmra.mxu1 %vm211_vm2, %v62_v54 }
  0x5a   :  { %407 = vmatprep.mubr.bf16.mxu0 %v1699_v12  ;;  %630 = vmatprep.mubr.bf16.mxu1 %v1699_v12 }
  0x61   :  { %1460 = vmatmul.mubr.msk.bf16.gmra.mxu0 %vm211_vm2, %v63_v57  ;;  %1479 = vmatmul.mubr.msk.bf16.gmra.mxu1 %vm211_vm2, %v63_v57 }
  0x62   :  { %417 = vmatprep.mubr.bf16.mxu0 %v1699_v12  ;;  %640 = vmatprep.mubr.bf16.mxu1 %v1699_v12 }
  0x69   :  { %1461 = vmatmul.mubr.msk.bf16.gmra.mxu0 %vm211_vm2, %v64_v60  ;;  %1480 = vmatmul.mubr.msk.bf16.gmra.mxu1 %vm211_vm2, %v64_v60 }
  0x6a   :  { %427 = vmatprep.mubr.bf16.mxu0 %v1699_v12  ;;  %650 = vmatprep.mubr.bf16.mxu1 %v1699_v12 }
  0x71   :  { %1462 = vmatmul.mubr.msk.bf16.gmra.mxu0 %vm211_vm2, %v65_v63  ;;  %1481 = vmatmul.mubr.msk.bf16.gmra.mxu1 %vm211_vm2, %v65_v63 }
  0x72   :  { %437 = vmatprep.mubr.bf16.mxu0 %v1699_v12  ;;  %660 = vmatprep.mubr.bf16.mxu1 %v1699_v12 }
  0x79   :  { %1463 = vmatmul.mubr.msk.bf16.gmra.mxu0 %vm211_vm2, %v66_v2  ;;  %1482 = vmatmul.mubr.msk.bf16.gmra.mxu1 %vm211_vm2, %v66_v2 }
  0x7a   :  { %447 = vmatprep.mubr.bf16.mxu0 %v1699_v12  ;;  %670 = vmatprep.mubr.bf16.mxu1 %v1699_v12 }
  0x81   :  { %1464 = vmatmul.mubr.msk.bf16.gmra.mxu0 %vm211_vm2, %v67_v5  ;;  %1483 = vmatmul.mubr.msk.bf16.gmra.mxu1 %vm211_vm2, %v67_v5 }
  0x82   :  { %457 = vmatprep.mubr.bf16.mxu0 %v1699_v12  ;;  %680 = vmatprep.mubr.bf16.mxu1 %v1699_v12 }
  0x89   :  { %1465 = vmatmul.mubr.msk.bf16.gmra.mxu0 %vm211_vm2, %v68_v8  ;;  %1484 = vmatmul.mubr.msk.bf16.gmra.mxu1 %vm211_vm2, %v68_v8 }
  0x8a   :  { %467 = vmatprep.mubr.bf16.mxu0 %v1699_v12  ;;  %690 = vmatprep.mubr.bf16.mxu1 %v1699_v12 }
  0x91   :  { %1466 = vmatmul.mubr.msk.bf16.gmra.mxu0 %vm211_vm2, %v69_v11  ;;  %1485 = vmatmul.mubr.msk.bf16.gmra.mxu1 %vm211_vm2, %v69_v11 }
  0x92   :  { %477 = vmatprep.mubr.bf16.mxu0 %v1699_v12  ;;  %700 = vmatprep.mubr.bf16.mxu1 %v1699_v12 }
  0x99   :  { %1467 = vmatmul.mubr.msk.bf16.gmra.mxu0 %vm211_vm2, %v70_v15  ;;  %1486 = vmatmul.mubr.msk.bf16.gmra.mxu1 %vm211_vm2, %v70_v15 }
  0x9a   :  { %487 = vmatprep.mubr.bf16.mxu0 %v1699_v12  ;;  %710 = vmatprep.mubr.bf16.mxu1 %v1699_v12 }
  0xa1   :  { %1468 = vmatmul.mubr.msk.bf16.gmra.mxu0 %vm211_vm2, %v71_v18  ;;  %1487 = vmatmul.mubr.msk.bf16.gmra.mxu1 %vm211_vm2, %v71_v18 }
  0xa2   :  { %497 = vmatprep.mubr.bf16.mxu0 %v1699_v12  ;;  %720 = vmatprep.mubr.bf16.mxu1 %v1699_v12  ;;  %v1980_v12 = vrot.slane %v93_v25, %v101_v27 }
  0xa9   :  { %1469 = vmatmul.mubr.msk.bf16.gmra.mxu0 %vm211_vm2, %v72_v21  ;;  %1488 = vmatmul.mubr.msk.bf16.gmra.mxu1 %vm211_vm2, %v72_v21 }
  0xd9   :  { %v319_v31 = vpop.f32.mrf.mxu0  ;;  %v542_v34 = vpop.f32.mrf.mxu1 }
  0xda   :  { %v320_v33 = vadd.f32 %v319_v31, %v1976_v29  ;;  %v543_v35 = vadd.f32 %v542_v34, %v1978_v30 }
  0xdb   :  { %v321_v36 = vpop.f32.mrf.mxu0  ;;  %v544_v38 = vpop.f32.mrf.mxu1 }
  0xdc   :  { %v322_v37 = vadd.f32 %v321_v36, %v1980_v12  ;;  %v545_v39 = vadd.f32 %v544_v38, %v1982_v32  ;;  %v731_v41 = vmax.f32 %v320_v33, 0.0  ;;  %v733_v45 = vmax.f32 %v543_v35, 0.0 }
  0xdd   :  { %v323_v40 = vpop.f32.mrf.mxu0  ;;  %v546_v44 = vpop.f32.mrf.mxu1 }
  0xde   :  { %v732_v42 = vmax.f32 %v322_v37, 0.0  ;;  %v324_v43 = vadd.f32 %v323_v40, %v1976_v29  ;;  %v734_v46 = vmax.f32 %v545_v39, 0.0  ;;  %v547_v47 = vadd.f32 %v546_v44, %v1978_v30 }
  0xdf   :  { %v325_v48 = vpop.f32.mrf.mxu0  ;;  %v548_v51 = vpop.f32.mrf.mxu1 }
  0xe0   :  { %v1565_v49 = vpack.c.bf16 %v732_v42, %v731_v41  ;;  %v326_v50 = vadd.f32 %v325_v48, %v1980_v12  ;;  %v1566_v52 = vpack.c.bf16 %v734_v46, %v733_v45  ;;  %v549_v53 = vadd.f32 %v548_v51, %v1982_v32 }
  0xe1   :  { %v329_v54 = vpop.f32.mrf.mxu0  ;;  %v735_v55 = vmax.f32 %v324_v43, 0.0  ;;  %v552_v58 = vpop.f32.mrf.mxu1  ;;  %v737_v59 = vmax.f32 %v547_v47, 0.0 }
  0xe2   :  { %1339 = vst [vmem:[#allocation2] sm:$0xff] %v1565_v49  ;;  %v736_v56 = vmax.f32 %v326_v50, 0.0  ;;  %v330_v57 = vadd.f32 %v329_v54, %v1976_v29  ;;  %1340 = vst [vmem:[#allocation2 + $0x8] sm:$0xff] %v1566_v52  ;;  %v738_v60 = vmax.f32 %v549_v53, 0.0  ;;  %v553_v61 = vadd.f32 %v552_v58, %v1978_v30 }
  0xe3   :  { %v331_v62 = vpop.f32.mrf.mxu0  ;;  %v554_v1 = vpop.f32.mrf.mxu1 }
  0xe4   :  { %v1567_v63 = vpack.c.bf16 %v736_v56, %v735_v55  ;;  %v332_v0 = vadd.f32 %v331_v62, %v1980_v12  ;;  %v1568_v2 = vpack.c.bf16 %v738_v60, %v737_v59  ;;  %v555_v3 = vadd.f32 %v554_v1, %v1982_v32 }
  0xe5   :  { %v333_v4 = vpop.f32.mrf.mxu0  ;;  %v739_v5 = vmax.f32 %v330_v57, 0.0  ;;  %v556_v8 = vpop.f32.mrf.mxu1  ;;  %v741_v9 = vmax.f32 %v553_v61, 0.0 }
  0xe6   :  { %1341 = vst [vmem:[#allocation2 + $0x10] sm:$0xff] %v1567_v63  ;;  %v740_v6 = vmax.f32 %v332_v0, 0.0  ;;  %v334_v7 = vadd.f32 %v333_v4, %v1976_v29  ;;  %1342 = vst [vmem:[#allocation2 + $0x18] sm:$0xff] %v1568_v2  ;;  %v742_v10 = vmax.f32 %v555_v3, 0.0  ;;  %v557_v11 = vadd.f32 %v556_v8, %v1978_v30 }
  0xe7   :  { %v335_v13 = vpop.f32.mrf.mxu0  ;;  %v558_v16 = vpop.f32.mrf.mxu1 }
  0xe8   :  { %v1569_v14 = vpack.c.bf16 %v740_v6, %v739_v5  ;;  %v336_v15 = vadd.f32 %v335_v13, %v1980_v12  ;;  %v1570_v17 = vpack.c.bf16 %v742_v10, %v741_v9  ;;  %v559_v18 = vadd.f32 %v558_v16, %v1982_v32 }
  0xe9   :  { %v339_v19 = vpop.f32.mrf.mxu0  ;;  %v743_v20 = vmax.f32 %v334_v7, 0.0  ;;  %v562_v23 = vpop.f32.mrf.mxu1  ;;  %v745_v24 = vmax.f32 %v557_v11, 0.0 }
  0xea   :  { %1343 = vst [vmem:[#allocation2 + $0x20] sm:$0xff] %v1569_v14  ;;  %v744_v21 = vmax.f32 %v336_v15, 0.0  ;;  %v340_v22 = vadd.f32 %v339_v19, %v1976_v29  ;;  %1344 = vst [vmem:[#allocation2 + $0x28] sm:$0xff] %v1570_v17  ;;  %v746_v25 = vmax.f32 %v559_v18, 0.0  ;;  %v563_v26 = vadd.f32 %v562_v23, %v1978_v30 }
  0xeb   :  { %v341_v27 = vpop.f32.mrf.mxu0  ;;  %v564_v33 = vpop.f32.mrf.mxu1 }
  0xec   :  { %v1571_v28 = vpack.c.bf16 %v744_v21, %v743_v20  ;;  %v342_v31 = vadd.f32 %v341_v27, %v1980_v12  ;;  %v1572_v34 = vpack.c.bf16 %v746_v25, %v745_v24  ;;  %v565_v35 = vadd.f32 %v564_v33, %v1982_v32 }
  0xed   :  { %v343_v36 = vpop.f32.mrf.mxu0  ;;  %v747_v37 = vmax.f32 %v340_v22, 0.0  ;;  %v566_v40 = vpop.f32.mrf.mxu1  ;;  %v749_v41 = vmax.f32 %v563_v26, 0.0 }
  0xee   :  { %1345 = vst [vmem:[#allocation2 + $0x30] sm:$0xff] %v1571_v28  ;;  %v748_v38 = vmax.f32 %v342_v31, 0.0  ;;  %v344_v39 = vadd.f32 %v343_v36, %v1976_v29  ;;  %1346 = vst [vmem:[#allocation2 + $0x38] sm:$0xff] %v1572_v34  ;;  %v750_v42 = vmax.f32 %v565_v35, 0.0  ;;  %v567_v43 = vadd.f32 %v566_v40, %v1978_v30 }
  0xef   :  { %v345_v44 = vpop.f32.mrf.mxu0  ;;  %v568_v47 = vpop.f32.mrf.mxu1 }
  0xf0   :  { %v1573_v45 = vpack.c.bf16 %v748_v38, %v747_v37  ;;  %v346_v46 = vadd.f32 %v345_v44, %v1980_v12  ;;  %v1574_v48 = vpack.c.bf16 %v750_v42, %v749_v41  ;;  %v569_v49 = vadd.f32 %v568_v47, %v1982_v32 }
  0xf1   :  { %v349_v50 = vpop.f32.mrf.mxu0  ;;  %v751_v51 = vmax.f32 %v344_v39, 0.0  ;;  %v572_v54 = vpop.f32.mrf.mxu1  ;;  %v753_v55 = vmax.f32 %v567_v43, 0.0 }
  0xf2   :  { %1347 = vst [vmem:[#allocation2 + $0x40] sm:$0xff] %v1573_v45  ;;  %v752_v52 = vmax.f32 %v346_v46, 0.0  ;;  %v350_v53 = vadd.f32 %v349_v50, %v1976_v29  ;;  %1348 = vst [vmem:[#allocation2 + $0x48] sm:$0xff] %v1574_v48  ;;  %v754_v56 = vmax.f32 %v569_v49, 0.0  ;;  %v573_v57 = vadd.f32 %v572_v54, %v1978_v30 }
  0xf3   :  { %v351_v58 = vpop.f32.mrf.mxu0  ;;  %v574_v61 = vpop.f32.mrf.mxu1 }
  0xf4   :  { %v1575_v59 = vpack.c.bf16 %v752_v52, %v751_v51  ;;  %v352_v60 = vadd.f32 %v351_v58, %v1980_v12  ;;  %v1576_v62 = vpack.c.bf16 %v754_v56, %v753_v55  ;;  %v575_v63 = vadd.f32 %v574_v61, %v1982_v32 }
  0xf5   :  { %v353_v0 = vpop.f32.mrf.mxu0  ;;  %v755_v1 = vmax.f32 %v350_v53, 0.0  ;;  %v576_v4 = vpop.f32.mrf.mxu1  ;;  %v757_v5 = vmax.f32 %v573_v57, 0.0 }
  0xf6   :  { %1349 = vst [vmem:[#allocation2 + $0x50] sm:$0xff] %v1575_v59  ;;  %v756_v2 = vmax.f32 %v352_v60, 0.0  ;;  %v354_v3 = vadd.f32 %v353_v0, %v1976_v29  ;;  %1350 = vst [vmem:[#allocation2 + $0x58] sm:$0xff] %v1576_v62  ;;  %v758_v6 = vmax.f32 %v575_v63, 0.0  ;;  %v577_v7 = vadd.f32 %v576_v4, %v1978_v30 }
  0xf7   :  { %v355_v8 = vpop.f32.mrf.mxu0  ;;  %v578_v11 = vpop.f32.mrf.mxu1 }
  0xf8   :  { %v1577_v9 = vpack.c.bf16 %v756_v2, %v755_v1  ;;  %v356_v10 = vadd.f32 %v355_v8, %v1980_v12  ;;  %v1578_v13 = vpack.c.bf16 %v758_v6, %v757_v5  ;;  %v579_v14 = vadd.f32 %v578_v11, %v1982_v32 }
  0xf9   :  { %v359_v15 = vpop.f32.mrf.mxu0  ;;  %v759_v16 = vmax.f32 %v354_v3, 0.0  ;;  %v582_v19 = vpop.f32.mrf.mxu1  ;;  %v761_v20 = vmax.f32 %v577_v7, 0.0 }
  0xfa   :  { %1351 = vst [vmem:[#allocation2 + $0x60] sm:$0xff] %v1577_v9  ;;  %v760_v17 = vmax.f32 %v356_v10, 0.0  ;;  %v360_v18 = vadd.f32 %v359_v15, %v1976_v29  ;;  %1352 = vst [vmem:[#allocation2 + $0x68] sm:$0xff] %v1578_v13  ;;  %v762_v21 = vmax.f32 %v579_v14, 0.0  ;;  %v583_v22 = vadd.f32 %v582_v19, %v1978_v30 }
  0xfb   :  { %v361_v23 = vpop.f32.mrf.mxu0  ;;  %v584_v26 = vpop.f32.mrf.mxu1 }
  0xfc   :  { %v1579_v24 = vpack.c.bf16 %v760_v17, %v759_v16  ;;  %v362_v25 = vadd.f32 %v361_v23, %v1980_v12  ;;  %v1580_v27 = vpack.c.bf16 %v762_v21, %v761_v20  ;;  %v585_v28 = vadd.f32 %v584_v26, %v1982_v32 }
  0xfd   :  { %v363_v31 = vpop.f32.mrf.mxu0  ;;  %v763_v33 = vmax.f32 %v360_v18, 0.0  ;;  %v586_v36 = vpop.f32.mrf.mxu1  ;;  %v765_v37 = vmax.f32 %v583_v22, 0.0 }
  0xfe   :  { %1353 = vst [vmem:[#allocation2 + $0x70] sm:$0xff] %v1579_v24  ;;  %v764_v34 = vmax.f32 %v362_v25, 0.0  ;;  %v364_v35 = vadd.f32 %v363_v31, %v1976_v29  ;;  %1354 = vst [vmem:[#allocation2 + $0x78] sm:$0xff] %v1580_v27  ;;  %v766_v38 = vmax.f32 %v585_v28, 0.0  ;;  %v587_v39 = vadd.f32 %v586_v36, %v1978_v30 }
  0xff   :  { %v365_v40 = vpop.f32.mrf.mxu0  ;;  %v588_v43 = vpop.f32.mrf.mxu1 }
 0x100   :  { %v1581_v41 = vpack.c.bf16 %v764_v34, %v763_v33  ;;  %v366_v42 = vadd.f32 %v365_v40, %v1980_v12  ;;  %v1582_v44 = vpack.c.bf16 %v766_v38, %v765_v37  ;;  %v589_v45 = vadd.f32 %v588_v43, %v1982_v32 }
 0x101   :  { %v369_v46 = vpop.f32.mrf.mxu0  ;;  %v767_v47 = vmax.f32 %v364_v35, 0.0  ;;  %v592_v50 = vpop.f32.mrf.mxu1  ;;  %v769_v51 = vmax.f32 %v587_v39, 0.0 }
 0x102   :  { %1355 = vst [vmem:[#allocation2 + $0x80] sm:$0xff] %v1581_v41  ;;  %v768_v48 = vmax.f32 %v366_v42, 0.0  ;;  %v370_v49 = vadd.f32 %v369_v46, %v1976_v29  ;;  %1356 = vst [vmem:[#allocation2 + $0x88] sm:$0xff] %v1582_v44  ;;  %v770_v52 = vmax.f32 %v589_v45, 0.0  ;;  %v593_v53 = vadd.f32 %v592_v50, %v1978_v30 }
 0x103   :  { %v371_v54 = vpop.f32.mrf.mxu0  ;;  %v594_v57 = vpop.f32.mrf.mxu1 }
 0x104   :  { %v1583_v55 = vpack.c.bf16 %v768_v48, %v767_v47  ;;  %v372_v56 = vadd.f32 %v371_v54, %v1980_v12  ;;  %v1584_v58 = vpack.c.bf16 %v770_v52, %v769_v51  ;;  %v595_v59 = vadd.f32 %v594_v57, %v1982_v32 }
 0x105   :  { %v373_v60 = vpop.f32.mrf.mxu0  ;;  %v771_v61 = vmax.f32 %v370_v49, 0.0  ;;  %v596_v0 = vpop.f32.mrf.mxu1  ;;  %v773_v1 = vmax.f32 %v593_v53, 0.0 }
 0x106   :  { %1357 = vst [vmem:[#allocation2 + $0x90] sm:$0xff] %v1583_v55  ;;  %v772_v62 = vmax.f32 %v372_v56, 0.0  ;;  %v374_v63 = vadd.f32 %v373_v60, %v1976_v29  ;;  %1358 = vst [vmem:[#allocation2 + $0x98] sm:$0xff] %v1584_v58  ;;  %v774_v2 = vmax.f32 %v595_v59, 0.0  ;;  %v597_v3 = vadd.f32 %v596_v0, %v1978_v30 }
 0x107   :  { %v375_v4 = vpop.f32.mrf.mxu0  ;;  %v598_v7 = vpop.f32.mrf.mxu1 }
 0x108   :  { %v1585_v5 = vpack.c.bf16 %v772_v62, %v771_v61  ;;  %v376_v6 = vadd.f32 %v375_v4, %v1980_v12  ;;  %v1586_v8 = vpack.c.bf16 %v774_v2, %v773_v1  ;;  %v599_v9 = vadd.f32 %v598_v7, %v1982_v32 }
 0x109   :  { %v379_v10 = vpop.f32.mrf.mxu0  ;;  %v775_v11 = vmax.f32 %v374_v63, 0.0  ;;  %v602_v15 = vpop.f32.mrf.mxu1  ;;  %v777_v16 = vmax.f32 %v597_v3, 0.0 }
 0x10a   :  { %1359 = vst [vmem:[#allocation2 + $0xa0] sm:$0xff] %v1585_v5  ;;  %v776_v13 = vmax.f32 %v376_v6, 0.0  ;;  %v380_v14 = vadd.f32 %v379_v10, %v1976_v29  ;;  %1360 = vst [vmem:[#allocation2 + $0xa8] sm:$0xff] %v1586_v8  ;;  %v778_v17 = vmax.f32 %v599_v9, 0.0  ;;  %v603_v18 = vadd.f32 %v602_v15, %v1978_v30 }
 0x10b   :  { %v381_v19 = vpop.f32.mrf.mxu0  ;;  %v604_v22 = vpop.f32.mrf.mxu1 }
 0x10c   :  { %v1587_v20 = vpack.c.bf16 %v776_v13, %v775_v11  ;;  %v382_v21 = vadd.f32 %v381_v19, %v1980_v12  ;;  %v1588_v23 = vpack.c.bf16 %v778_v17, %v777_v16  ;;  %v605_v24 = vadd.f32 %v604_v22, %v1982_v32 }
 0x10d   :  { %v383_v25 = vpop.f32.mrf.mxu0  ;;  %v779_v26 = vmax.f32 %v380_v14, 0.0  ;;  %v606_v31 = vpop.f32.mrf.mxu1  ;;  %v781_v33 = vmax.f32 %v603_v18, 0.0 }
 0x10e   :  { %1361 = vst [vmem:[#allocation2 + $0xb0] sm:$0xff] %v1587_v20  ;;  %v780_v27 = vmax.f32 %v382_v21, 0.0  ;;  %v384_v28 = vadd.f32 %v383_v25, %v1976_v29  ;;  %1362 = vst [vmem:[#allocation2 + $0xb8] sm:$0xff] %v1588_v23  ;;  %v782_v34 = vmax.f32 %v605_v24, 0.0  ;;  %v607_v35 = vadd.f32 %v606_v31, %v1978_v30 }
 0x10f   :  { %v385_v36 = vpop.f32.mrf.mxu0  ;;  %v608_v39 = vpop.f32.mrf.mxu1 }
 0x110   :  { %v1589_v37 = vpack.c.bf16 %v780_v27, %v779_v26  ;;  %v386_v38 = vadd.f32 %v385_v36, %v1980_v12  ;;  %v1590_v40 = vpack.c.bf16 %v782_v34, %v781_v33  ;;  %v609_v41 = vadd.f32 %v608_v39, %v1982_v32 }
 0x111   :  { %v389_v42 = vpop.f32.mrf.mxu0  ;;  %v783_v43 = vmax.f32 %v384_v28, 0.0  ;;  %v612_v46 = vpop.f32.mrf.mxu1  ;;  %v785_v47 = vmax.f32 %v607_v35, 0.0 }
 0x112   :  { %1363 = vst [vmem:[#allocation2 + $0xc0] sm:$0xff] %v1589_v37  ;;  %v784_v44 = vmax.f32 %v386_v38, 0.0  ;;  %v390_v45 = vadd.f32 %v389_v42, %v1976_v29  ;;  %1364 = vst [vmem:[#allocation2 + $0xc8] sm:$0xff] %v1590_v40  ;;  %v786_v48 = vmax.f32 %v609_v41, 0.0  ;;  %v613_v49 = vadd.f32 %v612_v46, %v1978_v30 }
 0x113   :  { %v391_v50 = vpop.f32.mrf.mxu0  ;;  %v614_v53 = vpop.f32.mrf.mxu1 }
 0x114   :  { %v1591_v51 = vpack.c.bf16 %v784_v44, %v783_v43  ;;  %v392_v52 = vadd.f32 %v391_v50, %v1980_v12  ;;  %v1592_v54 = vpack.c.bf16 %v786_v48, %v785_v47  ;;  %v615_v55 = vadd.f32 %v614_v53, %v1982_v32 }
 0x115   :  { %v393_v56 = vpop.f32.mrf.mxu0  ;;  %v787_v57 = vmax.f32 %v390_v45, 0.0  ;;  %v616_v60 = vpop.f32.mrf.mxu1  ;;  %v789_v61 = vmax.f32 %v613_v49, 0.0 }
 0x116   :  { %1365 = vst [vmem:[#allocation2 + $0xd0] sm:$0xff] %v1591_v51  ;;  %v788_v58 = vmax.f32 %v392_v52, 0.0  ;;  %v394_v59 = vadd.f32 %v393_v56, %v1976_v29  ;;  %1366 = vst [vmem:[#allocation2 + $0xd8] sm:$0xff] %v1592_v54  ;;  %v790_v62 = vmax.f32 %v615_v55, 0.0  ;;  %v617_v63 = vadd.f32 %v616_v60, %v1978_v30 }
 0x117   :  { %v395_v0 = vpop.f32.mrf.mxu0  ;;  %v618_v3 = vpop.f32.mrf.mxu1 }
 0x118   :  { %v1593_v1 = vpack.c.bf16 %v788_v58, %v787_v57  ;;  %v396_v2 = vadd.f32 %v395_v0, %v1980_v12  ;;  %v1594_v4 = vpack.c.bf16 %v790_v62, %v789_v61  ;;  %v619_v5 = vadd.f32 %v618_v3, %v1982_v32 }
 0x119   :  { %v399_v6 = vpop.f32.mrf.mxu0  ;;  %v791_v7 = vmax.f32 %v394_v59, 0.0  ;;  %v622_v10 = vpop.f32.mrf.mxu1  ;;  %v793_v11 = vmax.f32 %v617_v63, 0.0 }
 0x11a   :  { %1367 = vst [vmem:[#allocation2 + $0xe0] sm:$0xff] %v1593_v1  ;;  %v792_v8 = vmax.f32 %v396_v2, 0.0  ;;  %v400_v9 = vadd.f32 %v399_v6, %v1976_v29  ;;  %1368 = vst [vmem:[#allocation2 + $0xe8] sm:$0xff] %v1594_v4  ;;  %v794_v13 = vmax.f32 %v619_v5, 0.0  ;;  %v623_v14 = vadd.f32 %v622_v10, %v1978_v30 }
 0x11b   :  { %v401_v15 = vpop.f32.mrf.mxu0  ;;  %v624_v18 = vpop.f32.mrf.mxu1 }
 0x11c   :  { %v1595_v16 = vpack.c.bf16 %v792_v8, %v791_v7  ;;  %v402_v17 = vadd.f32 %v401_v15, %v1980_v12  ;;  %v1596_v19 = vpack.c.bf16 %v794_v13, %v793_v11  ;;  %v625_v20 = vadd.f32 %v624_v18, %v1982_v32 }
 0x11d   :  { %v403_v21 = vpop.f32.mrf.mxu0  ;;  %v795_v22 = vmax.f32 %v400_v9, 0.0  ;;  %v626_v25 = vpop.f32.mrf.mxu1  ;;  %v797_v26 = vmax.f32 %v623_v14, 0.0 }
 0x11e   :  { %1369 = vst [vmem:[#allocation2 + $0xf0] sm:$0xff] %v1595_v16  ;;  %v796_v23 = vmax.f32 %v402_v17, 0.0  ;;  %v404_v24 = vadd.f32 %v403_v21, %v1976_v29  ;;  %1370 = vst [vmem:[#allocation2 + $0xf8] sm:$0xff] %v1596_v19  ;;  %v798_v27 = vmax.f32 %v625_v20, 0.0  ;;  %v627_v28 = vadd.f32 %v626_v25, %v1978_v30 }
 0x11f   :  { %v405_v31 = vpop.f32.mrf.mxu0  ;;  %v628_v35 = vpop.f32.mrf.mxu1 }
 0x120   :  { %v1597_v33 = vpack.c.bf16 %v796_v23, %v795_v22  ;;  %v406_v34 = vadd.f32 %v405_v31, %v1980_v12  ;;  %v1598_v36 = vpack.c.bf16 %v798_v27, %v797_v26  ;;  %v629_v37 = vadd.f32 %v628_v35, %v1982_v32 }
 0x121   :  { %v409_v38 = vpop.f32.mrf.mxu0  ;;  %v799_v39 = vmax.f32 %v404_v24, 0.0  ;;  %v632_v42 = vpop.f32.mrf.mxu1  ;;  %v801_v43 = vmax.f32 %v627_v28, 0.0 }
 0x122   :  { %1371 = vst [vmem:[#allocation2 + $0x100] sm:$0xff] %v1597_v33  ;;  %v800_v40 = vmax.f32 %v406_v34, 0.0  ;;  %v410_v41 = vadd.f32 %v409_v38, %v1976_v29  ;;  %1372 = vst [vmem:[#allocation2 + $0x108] sm:$0xff] %v1598_v36  ;;  %v802_v44 = vmax.f32 %v629_v37, 0.0  ;;  %v633_v45 = vadd.f32 %v632_v42, %v1978_v30 }
 0x123   :  { %v411_v46 = vpop.f32.mrf.mxu0  ;;  %v634_v49 = vpop.f32.mrf.mxu1 }
 0x124   :  { %v1599_v47 = vpack.c.bf16 %v800_v40, %v799_v39  ;;  %v412_v48 = vadd.f32 %v411_v46, %v1980_v12  ;;  %v1600_v50 = vpack.c.bf16 %v802_v44, %v801_v43  ;;  %v635_v51 = vadd.f32 %v634_v49, %v1982_v32 }
 0x125   :  { %v413_v52 = vpop.f32.mrf.mxu0  ;;  %v803_v53 = vmax.f32 %v410_v41, 0.0  ;;  %v636_v56 = vpop.f32.mrf.mxu1  ;;  %v805_v57 = vmax.f32 %v633_v45, 0.0 }
 0x126   :  { %1373 = vst [vmem:[#allocation2 + $0x110] sm:$0xff] %v1599_v47  ;;  %v804_v54 = vmax.f32 %v412_v48, 0.0  ;;  %v414_v55 = vadd.f32 %v413_v52, %v1976_v29  ;;  %1374 = vst [vmem:[#allocation2 + $0x118] sm:$0xff] %v1600_v50  ;;  %v806_v58 = vmax.f32 %v635_v51, 0.0  ;;  %v637_v59 = vadd.f32 %v636_v56, %v1978_v30 }
 0x127   :  { %v415_v60 = vpop.f32.mrf.mxu0  ;;  %v638_v63 = vpop.f32.mrf.mxu1 }
 0x128   :  { %v1601_v61 = vpack.c.bf16 %v804_v54, %v803_v53  ;;  %v416_v62 = vadd.f32 %v415_v60, %v1980_v12  ;;  %v1602_v0 = vpack.c.bf16 %v806_v58, %v805_v57  ;;  %v639_v1 = vadd.f32 %v638_v63, %v1982_v32 }
 0x129   :  { %v419_v2 = vpop.f32.mrf.mxu0  ;;  %v807_v3 = vmax.f32 %v414_v55, 0.0  ;;  %v642_v6 = vpop.f32.mrf.mxu1  ;;  %v809_v7 = vmax.f32 %v637_v59, 0.0 }
 0x12a   :  { %1375 = vst [vmem:[#allocation2 + $0x120] sm:$0xff] %v1601_v61  ;;  %v808_v4 = vmax.f32 %v416_v62, 0.0  ;;  %v420_v5 = vadd.f32 %v419_v2, %v1976_v29  ;;  %1376 = vst [vmem:[#allocation2 + $0x128] sm:$0xff] %v1602_v0  ;;  %v810_v8 = vmax.f32 %v639_v1, 0.0  ;;  %v643_v9 = vadd.f32 %v642_v6, %v1978_v30 }
 0x12b   :  { %v421_v10 = vpop.f32.mrf.mxu0  ;;  %v644_v14 = vpop.f32.mrf.mxu1 }
 0x12c   :  { %v1603_v11 = vpack.c.bf16 %v808_v4, %v807_v3  ;;  %v422_v13 = vadd.f32 %v421_v10, %v1980_v12  ;;  %v1604_v15 = vpack.c.bf16 %v810_v8, %v809_v7  ;;  %v645_v16 = vadd.f32 %v644_v14, %v1982_v32 }
 0x12d   :  { %v423_v17 = vpop.f32.mrf.mxu0  ;;  %v811_v18 = vmax.f32 %v420_v5, 0.0  ;;  %v646_v21 = vpop.f32.mrf.mxu1  ;;  %v813_v22 = vmax.f32 %v643_v9, 0.0 }
 0x12e   :  { %1377 = vst [vmem:[#allocation2 + $0x130] sm:$0xff] %v1603_v11  ;;  %v812_v19 = vmax.f32 %v422_v13, 0.0  ;;  %v424_v20 = vadd.f32 %v423_v17, %v1976_v29  ;;  %1378 = vst [vmem:[#allocation2 + $0x138] sm:$0xff] %v1604_v15  ;;  %v814_v23 = vmax.f32 %v645_v16, 0.0  ;;  %v647_v24 = vadd.f32 %v646_v21, %v1978_v30 }
 0x12f   :  { %v425_v25 = vpop.f32.mrf.mxu0  ;;  %v648_v28 = vpop.f32.mrf.mxu1 }
 0x130   :  { %v1605_v26 = vpack.c.bf16 %v812_v19, %v811_v18  ;;  %v426_v27 = vadd.f32 %v425_v25, %v1980_v12  ;;  %v1606_v31 = vpack.c.bf16 %v814_v23, %v813_v22  ;;  %v649_v33 = vadd.f32 %v648_v28, %v1982_v32 }
 0x131   :  { %v429_v34 = vpop.f32.mrf.mxu0  ;;  %v815_v35 = vmax.f32 %v424_v20, 0.0  ;;  %v652_v38 = vpop.f32.mrf.mxu1  ;;  %v817_v39 = vmax.f32 %v647_v24, 0.0 }
 0x132   :  { %1379 = vst [vmem:[#allocation2 + $0x140] sm:$0xff] %v1605_v26  ;;  %v816_v36 = vmax.f32 %v426_v27, 0.0  ;;  %v430_v37 = vadd.f32 %v429_v34, %v1976_v29  ;;  %1380 = vst [vmem:[#allocation2 + $0x148] sm:$0xff] %v1606_v31  ;;  %v818_v40 = vmax.f32 %v649_v33, 0.0  ;;  %v653_v41 = vadd.f32 %v652_v38, %v1978_v30 }
 0x133   :  { %v431_v42 = vpop.f32.mrf.mxu0  ;;  %v654_v45 = vpop.f32.mrf.mxu1 }
 0x134   :  { %v1607_v43 = vpack.c.bf16 %v816_v36, %v815_v35  ;;  %v432_v44 = vadd.f32 %v431_v42, %v1980_v12  ;;  %v1608_v46 = vpack.c.bf16 %v818_v40, %v817_v39  ;;  %v655_v47 = vadd.f32 %v654_v45, %v1982_v32 }
 0x135   :  { %v433_v48 = vpop.f32.mrf.mxu0  ;;  %v819_v49 = vmax.f32 %v430_v37, 0.0  ;;  %v656_v52 = vpop.f32.mrf.mxu1  ;;  %v821_v53 = vmax.f32 %v653_v41, 0.0 }
 0x136   :  { %1381 = vst [vmem:[#allocation2 + $0x150] sm:$0xff] %v1607_v43  ;;  %v820_v50 = vmax.f32 %v432_v44, 0.0  ;;  %v434_v51 = vadd.f32 %v433_v48, %v1976_v29  ;;  %1382 = vst [vmem:[#allocation2 + $0x158] sm:$0xff] %v1608_v46  ;;  %v822_v54 = vmax.f32 %v655_v47, 0.0  ;;  %v657_v55 = vadd.f32 %v656_v52, %v1978_v30 }
 0x137   :  { %v435_v56 = vpop.f32.mrf.mxu0  ;;  %v658_v59 = vpop.f32.mrf.mxu1 }
 0x138   :  { %v1609_v57 = vpack.c.bf16 %v820_v50, %v819_v49  ;;  %v436_v58 = vadd.f32 %v435_v56, %v1980_v12  ;;  %v1610_v60 = vpack.c.bf16 %v822_v54, %v821_v53  ;;  %v659_v61 = vadd.f32 %v658_v59, %v1982_v32 }
 0x139   :  { %v439_v62 = vpop.f32.mrf.mxu0  ;;  %v823_v63 = vmax.f32 %v434_v51, 0.0  ;;  %v662_v2 = vpop.f32.mrf.mxu1  ;;  %v825_v3 = vmax.f32 %v657_v55, 0.0 }
 0x13a   :  { %1383 = vst [vmem:[#allocation2 + $0x160] sm:$0xff] %v1609_v57  ;;  %v824_v0 = vmax.f32 %v436_v58, 0.0  ;;  %v440_v1 = vadd.f32 %v439_v62, %v1976_v29  ;;  %1384 = vst [vmem:[#allocation2 + $0x168] sm:$0xff] %v1610_v60  ;;  %v826_v4 = vmax.f32 %v659_v61, 0.0  ;;  %v663_v5 = vadd.f32 %v662_v2, %v1978_v30 }
 0x13b   :  { %v441_v6 = vpop.f32.mrf.mxu0  ;;  %v664_v9 = vpop.f32.mrf.mxu1 }
 0x13c   :  { %v1611_v7 = vpack.c.bf16 %v824_v0, %v823_v63  ;;  %v442_v8 = vadd.f32 %v441_v6, %v1980_v12  ;;  %v1612_v10 = vpack.c.bf16 %v826_v4, %v825_v3  ;;  %v665_v11 = vadd.f32 %v664_v9, %v1982_v32 }
 0x13d   :  { %v443_v13 = vpop.f32.mrf.mxu0  ;;  %v827_v14 = vmax.f32 %v440_v1, 0.0  ;;  %v666_v17 = vpop.f32.mrf.mxu1  ;;  %v829_v18 = vmax.f32 %v663_v5, 0.0 }
 0x13e   :  { %1385 = vst [vmem:[#allocation2 + $0x170] sm:$0xff] %v1611_v7  ;;  %v828_v15 = vmax.f32 %v442_v8, 0.0  ;;  %v444_v16 = vadd.f32 %v443_v13, %v1976_v29  ;;  %1386 = vst [vmem:[#allocation2 + $0x178] sm:$0xff] %v1612_v10  ;;  %v830_v19 = vmax.f32 %v665_v11, 0.0  ;;  %v667_v20 = vadd.f32 %v666_v17, %v1978_v30 }
 0x13f   :  { %v445_v21 = vpop.f32.mrf.mxu0  ;;  %v668_v24 = vpop.f32.mrf.mxu1 }
 0x140   :  { %v1613_v22 = vpack.c.bf16 %v828_v15, %v827_v14  ;;  %v446_v23 = vadd.f32 %v445_v21, %v1980_v12  ;;  %v1614_v25 = vpack.c.bf16 %v830_v19, %v829_v18  ;;  %v669_v26 = vadd.f32 %v668_v24, %v1982_v32 }
 0x141   :  { %v449_v27 = vpop.f32.mrf.mxu0  ;;  %v831_v28 = vmax.f32 %v444_v16, 0.0  ;;  %v672_v34 = vpop.f32.mrf.mxu1  ;;  %v833_v35 = vmax.f32 %v667_v20, 0.0 }
 0x142   :  { %1387 = vst [vmem:[#allocation2 + $0x180] sm:$0xff] %v1613_v22  ;;  %v832_v31 = vmax.f32 %v446_v23, 0.0  ;;  %v450_v33 = vadd.f32 %v449_v27, %v1976_v29  ;;  %1388 = vst [vmem:[#allocation2 + $0x188] sm:$0xff] %v1614_v25  ;;  %v834_v36 = vmax.f32 %v669_v26, 0.0  ;;  %v673_v37 = vadd.f32 %v672_v34, %v1978_v30 }
 0x143   :  { %v451_v38 = vpop.f32.mrf.mxu0  ;;  %v674_v41 = vpop.f32.mrf.mxu1 }
 0x144   :  { %v1615_v39 = vpack.c.bf16 %v832_v31, %v831_v28  ;;  %v452_v40 = vadd.f32 %v451_v38, %v1980_v12  ;;  %v1616_v42 = vpack.c.bf16 %v834_v36, %v833_v35  ;;  %v675_v43 = vadd.f32 %v674_v41, %v1982_v32 }
 0x145   :  { %v453_v44 = vpop.f32.mrf.mxu0  ;;  %v835_v45 = vmax.f32 %v450_v33, 0.0  ;;  %v676_v48 = vpop.f32.mrf.mxu1  ;;  %v837_v49 = vmax.f32 %v673_v37, 0.0 }
 0x146   :  { %1389 = vst [vmem:[#allocation2 + $0x190] sm:$0xff] %v1615_v39  ;;  %v836_v46 = vmax.f32 %v452_v40, 0.0  ;;  %v454_v47 = vadd.f32 %v453_v44, %v1976_v29  ;;  %1390 = vst [vmem:[#allocation2 + $0x198] sm:$0xff] %v1616_v42  ;;  %v838_v50 = vmax.f32 %v675_v43, 0.0  ;;  %v677_v51 = vadd.f32 %v676_v48, %v1978_v30 }
 0x147   :  { %v455_v52 = vpop.f32.mrf.mxu0  ;;  %v678_v55 = vpop.f32.mrf.mxu1 }
 0x148   :  { %v1617_v53 = vpack.c.bf16 %v836_v46, %v835_v45  ;;  %v456_v54 = vadd.f32 %v455_v52, %v1980_v12  ;;  %v1618_v56 = vpack.c.bf16 %v838_v50, %v837_v49  ;;  %v679_v57 = vadd.f32 %v678_v55, %v1982_v32 }
 0x149   :  { %v459_v58 = vpop.f32.mrf.mxu0  ;;  %v839_v59 = vmax.f32 %v454_v47, 0.0  ;;  %v682_v62 = vpop.f32.mrf.mxu1  ;;  %v841_v63 = vmax.f32 %v677_v51, 0.0 }
 0x14a   :  { %1391 = vst [vmem:[#allocation2 + $0x1a0] sm:$0xff] %v1617_v53  ;;  %v840_v60 = vmax.f32 %v456_v54, 0.0  ;;  %v460_v61 = vadd.f32 %v459_v58, %v1976_v29  ;;  %1392 = vst [vmem:[#allocation2 + $0x1a8] sm:$0xff] %v1618_v56  ;;  %v842_v0 = vmax.f32 %v679_v57, 0.0  ;;  %v683_v1 = vadd.f32 %v682_v62, %v1978_v30 }
 0x14b   :  { %v461_v2 = vpop.f32.mrf.mxu0  ;;  %v684_v5 = vpop.f32.mrf.mxu1 }
 0x14c   :  { %v1619_v3 = vpack.c.bf16 %v840_v60, %v839_v59  ;;  %v462_v4 = vadd.f32 %v461_v2, %v1980_v12  ;;  %v1620_v6 = vpack.c.bf16 %v842_v0, %v841_v63  ;;  %v685_v7 = vadd.f32 %v684_v5, %v1982_v32 }
 0x14d   :  { %v463_v8 = vpop.f32.mrf.mxu0  ;;  %v843_v9 = vmax.f32 %v460_v61, 0.0  ;;  %v686_v13 = vpop.f32.mrf.mxu1  ;;  %v845_v14 = vmax.f32 %v683_v1, 0.0 }
 0x14e   :  { %1393 = vst [vmem:[#allocation2 + $0x1b0] sm:$0xff] %v1619_v3  ;;  %v844_v10 = vmax.f32 %v462_v4, 0.0  ;;  %v464_v11 = vadd.f32 %v463_v8, %v1976_v29  ;;  %1394 = vst [vmem:[#allocation2 + $0x1b8] sm:$0xff] %v1620_v6  ;;  %v846_v15 = vmax.f32 %v685_v7, 0.0  ;;  %v687_v16 = vadd.f32 %v686_v13, %v1978_v30 }
 0x14f   :  { %v465_v17 = vpop.f32.mrf.mxu0  ;;  %v688_v20 = vpop.f32.mrf.mxu1 }
 0x150   :  { %v1621_v18 = vpack.c.bf16 %v844_v10, %v843_v9  ;;  %v466_v19 = vadd.f32 %v465_v17, %v1980_v12  ;;  %v1622_v21 = vpack.c.bf16 %v846_v15, %v845_v14  ;;  %v689_v22 = vadd.f32 %v688_v20, %v1982_v32 }
 0x151   :  { %v469_v23 = vpop.f32.mrf.mxu0  ;;  %v847_v24 = vmax.f32 %v464_v11, 0.0  ;;  %v692_v27 = vpop.f32.mrf.mxu1  ;;  %v849_v28 = vmax.f32 %v687_v16, 0.0 }
 0x152   :  { %1395 = vst [vmem:[#allocation2 + $0x1c0] sm:$0xff] %v1621_v18  ;;  %v848_v25 = vmax.f32 %v466_v19, 0.0  ;;  %v470_v26 = vadd.f32 %v469_v23, %v1976_v29  ;;  %1396 = vst [vmem:[#allocation2 + $0x1c8] sm:$0xff] %v1622_v21  ;;  %v850_v31 = vmax.f32 %v689_v22, 0.0  ;;  %v693_v33 = vadd.f32 %v692_v27, %v1978_v30 }
 0x153   :  { %v471_v34 = vpop.f32.mrf.mxu0  ;;  %v694_v37 = vpop.f32.mrf.mxu1 }
 0x154   :  { %v1623_v35 = vpack.c.bf16 %v848_v25, %v847_v24  ;;  %v472_v36 = vadd.f32 %v471_v34, %v1980_v12  ;;  %v1624_v38 = vpack.c.bf16 %v850_v31, %v849_v28  ;;  %v695_v39 = vadd.f32 %v694_v37, %v1982_v32 }
 0x155   :  { %v473_v40 = vpop.f32.mrf.mxu0  ;;  %v851_v41 = vmax.f32 %v470_v26, 0.0  ;;  %v696_v44 = vpop.f32.mrf.mxu1  ;;  %v853_v45 = vmax.f32 %v693_v33, 0.0 }
 0x156   :  { %1397 = vst [vmem:[#allocation2 + $0x1d0] sm:$0xff] %v1623_v35  ;;  %v852_v42 = vmax.f32 %v472_v36, 0.0  ;;  %v474_v43 = vadd.f32 %v473_v40, %v1976_v29  ;;  %1398 = vst [vmem:[#allocation2 + $0x1d8] sm:$0xff] %v1624_v38  ;;  %v854_v46 = vmax.f32 %v695_v39, 0.0  ;;  %v697_v47 = vadd.f32 %v696_v44, %v1978_v30 }
 0x157   :  { %v475_v48 = vpop.f32.mrf.mxu0  ;;  %v698_v51 = vpop.f32.mrf.mxu1 }
 0x158   :  { %v1625_v49 = vpack.c.bf16 %v852_v42, %v851_v41  ;;  %v476_v50 = vadd.f32 %v475_v48, %v1980_v12  ;;  %v1626_v52 = vpack.c.bf16 %v854_v46, %v853_v45  ;;  %v699_v53 = vadd.f32 %v698_v51, %v1982_v32 }
 0x159   :  { %v479_v54 = vpop.f32.mrf.mxu0  ;;  %v855_v55 = vmax.f32 %v474_v43, 0.0  ;;  %v702_v58 = vpop.f32.mrf.mxu1  ;;  %v857_v59 = vmax.f32 %v697_v47, 0.0 }
 0x15a   :  { %1399 = vst [vmem:[#allocation2 + $0x1e0] sm:$0xff] %v1625_v49  ;;  %v856_v56 = vmax.f32 %v476_v50, 0.0  ;;  %v480_v57 = vadd.f32 %v479_v54, %v1976_v29  ;;  %1400 = vst [vmem:[#allocation2 + $0x1e8] sm:$0xff] %v1626_v52  ;;  %v858_v60 = vmax.f32 %v699_v53, 0.0  ;;  %v703_v61 = vadd.f32 %v702_v58, %v1978_v30 }
 0x15b   :  { %v481_v62 = vpop.f32.mrf.mxu0  ;;  %v704_v1 = vpop.f32.mrf.mxu1 }
 0x15c   :  { %v1627_v63 = vpack.c.bf16 %v856_v56, %v855_v55  ;;  %v482_v0 = vadd.f32 %v481_v62, %v1980_v12  ;;  %v1628_v2 = vpack.c.bf16 %v858_v60, %v857_v59  ;;  %v705_v3 = vadd.f32 %v704_v1, %v1982_v32 }
 0x15d   :  { %v483_v4 = vpop.f32.mrf.mxu0  ;;  %v859_v5 = vmax.f32 %v480_v57, 0.0  ;;  %v706_v8 = vpop.f32.mrf.mxu1  ;;  %v861_v9 = vmax.f32 %v703_v61, 0.0 }
 0x15e   :  { %1401 = vst [vmem:[#allocation2 + $0x1f0] sm:$0xff] %v1627_v63  ;;  %v860_v6 = vmax.f32 %v482_v0, 0.0  ;;  %v484_v7 = vadd.f32 %v483_v4, %v1976_v29  ;;  %1402 = vst [vmem:[#allocation2 + $0x1f8] sm:$0xff] %v1628_v2  ;;  %v862_v10 = vmax.f32 %v705_v3, 0.0  ;;  %v707_v11 = vadd.f32 %v706_v8, %v1978_v30 }
 0x15f   :  { %v485_v13 = vpop.f32.mrf.mxu0  ;;  %v708_v16 = vpop.f32.mrf.mxu1 }
 0x160   :  { %v1629_v14 = vpack.c.bf16 %v860_v6, %v859_v5  ;;  %v486_v15 = vadd.f32 %v485_v13, %v1980_v12  ;;  %v1630_v17 = vpack.c.bf16 %v862_v10, %v861_v9  ;;  %v709_v18 = vadd.f32 %v708_v16, %v1982_v32 }
 0x161   :  { %v489_v19 = vpop.f32.mrf.mxu0  ;;  %v863_v20 = vmax.f32 %v484_v7, 0.0  ;;  %v712_v23 = vpop.f32.mrf.mxu1  ;;  %v865_v24 = vmax.f32 %v707_v11, 0.0 }
 0x162   :  { %1403 = vst [vmem:[#allocation2 + $0x200] sm:$0xff] %v1629_v14  ;;  %v864_v21 = vmax.f32 %v486_v15, 0.0  ;;  %v490_v22 = vadd.f32 %v489_v19, %v1976_v29  ;;  %1404 = vst [vmem:[#allocation2 + $0x208] sm:$0xff] %v1630_v17  ;;  %v866_v25 = vmax.f32 %v709_v18, 0.0  ;;  %v713_v26 = vadd.f32 %v712_v23, %v1978_v30 }
 0x163   :  { %v491_v27 = vpop.f32.mrf.mxu0  ;;  %v714_v33 = vpop.f32.mrf.mxu1 }
 0x164   :  { %v1631_v28 = vpack.c.bf16 %v864_v21, %v863_v20  ;;  %v492_v31 = vadd.f32 %v491_v27, %v1980_v12  ;;  %v1632_v34 = vpack.c.bf16 %v866_v25, %v865_v24  ;;  %v715_v35 = vadd.f32 %v714_v33, %v1982_v32 }
 0x165   :  { %v493_v36 = vpop.f32.mrf.mxu0  ;;  %v867_v37 = vmax.f32 %v490_v22, 0.0  ;;  %v716_v40 = vpop.f32.mrf.mxu1  ;;  %v869_v41 = vmax.f32 %v713_v26, 0.0 }
 0x166   :  { %1405 = vst [vmem:[#allocation2 + $0x210] sm:$0xff] %v1631_v28  ;;  %v868_v38 = vmax.f32 %v492_v31, 0.0  ;;  %v494_v39 = vadd.f32 %v493_v36, %v1976_v29  ;;  %1406 = vst [vmem:[#allocation2 + $0x218] sm:$0xff] %v1632_v34  ;;  %v870_v42 = vmax.f32 %v715_v35, 0.0  ;;  %v717_v43 = vadd.f32 %v716_v40, %v1978_v30 }
 0x167   :  { %v495_v44 = vpop.f32.mrf.mxu0  ;;  %v718_v47 = vpop.f32.mrf.mxu1 }
 0x168   :  { %v1633_v45 = vpack.c.bf16 %v868_v38, %v867_v37  ;;  %v496_v46 = vadd.f32 %v495_v44, %v1980_v12  ;;  %v1634_v48 = vpack.c.bf16 %v870_v42, %v869_v41  ;;  %v719_v49 = vadd.f32 %v718_v47, %v1982_v32 }
 0x169   :  { %v499_v50 = vpop.f32.mrf.mxu0  ;;  %v871_v51 = vmax.f32 %v494_v39, 0.0  ;;  %v722_v54 = vpop.f32.mrf.mxu1  ;;  %v873_v55 = vmax.f32 %v717_v43, 0.0 }
 0x16a   :  { %1407 = vst [vmem:[#allocation2 + $0x220] sm:$0xff] %v1633_v45  ;;  %v872_v52 = vmax.f32 %v496_v46, 0.0  ;;  %v500_v53 = vadd.f32 %v499_v50, %v1976_v29  ;;  %1408 = vst [vmem:[#allocation2 + $0x228] sm:$0xff] %v1634_v48  ;;  %v874_v56 = vmax.f32 %v719_v49, 0.0  ;;  %v723_v57 = vadd.f32 %v722_v54, %v1978_v30 }
 0x16b   :  { %v501_v58 = vpop.f32.mrf.mxu0  ;;  %v724_v61 = vpop.f32.mrf.mxu1 }
 0x16c   :  { %v1635_v59 = vpack.c.bf16 %v872_v52, %v871_v51  ;;  %v502_v60 = vadd.f32 %v501_v58, %v1980_v12  ;;  %v1636_v62 = vpack.c.bf16 %v874_v56, %v873_v55  ;;  %v725_v63 = vadd.f32 %v724_v61, %v1982_v32 }
 0x16d   :  { %v503_v0 = vpop.f32.mrf.mxu0  ;;  %v875_v1 = vmax.f32 %v500_v53, 0.0  ;;  %v726_v4 = vpop.f32.mrf.mxu1  ;;  %v877_v5 = vmax.f32 %v723_v57, 0.0 }
 0x16e   :  { %1409 = vst [vmem:[#allocation2 + $0x230] sm:$0xff] %v1635_v59  ;;  %v876_v2 = vmax.f32 %v502_v60, 0.0  ;;  %v504_v3 = vadd.f32 %v503_v0, %v1976_v29  ;;  %1410 = vst [vmem:[#allocation2 + $0x238] sm:$0xff] %v1636_v62  ;;  %v878_v6 = vmax.f32 %v725_v63, 0.0  ;;  %v727_v7 = vadd.f32 %v726_v4, %v1978_v30 }
 0x16f   :  { %v505_v8 = vpop.f32.mrf.mxu0  ;;  %v728_v11 = vpop.f32.mrf.mxu1 }
 0x170   :  { %v1637_v9 = vpack.c.bf16 %v876_v2, %v875_v1  ;;  %v506_v10 = vadd.f32 %v505_v8, %v1980_v12  ;;  %v1638_v13 = vpack.c.bf16 %v878_v6, %v877_v5  ;;  %v729_v14 = vadd.f32 %v728_v11, %v1982_v32 }
 0x171   :  { %v879_v15 = vmax.f32 %v504_v3, 0.0  ;;  %v881_v29 = vmax.f32 %v727_v7, 0.0 }
 0x172   :  { %1411 = vst [vmem:[#allocation2 + $0x240] sm:$0xff] %v1637_v9  ;;  %v880_v16 = vmax.f32 %v506_v10, 0.0  ;;  %1412 = vst [vmem:[#allocation2 + $0x248] sm:$0xff] %v1638_v13  ;;  %v882_v17 = vmax.f32 %v729_v14, 0.0 }
 0x174   :  { %v1639_v18 = vpack.c.bf16 %v880_v16, %v879_v15  ;;  %v1640_v19 = vpack.c.bf16 %v882_v17, %v881_v29 }
 0x176   :  { %1413 = vst [vmem:[#allocation2 + $0x250] sm:$0xff] %v1639_v18  ;;  %1414 = vst [vmem:[#allocation2 + $0x258] sm:$0xff] %v1640_v19 }
 0x177   :  { %1687 = shalt.err (!%p1684_p4)
}
 0x178   :  { %s1701_s20 = smov 256   ;;  %s1702_s21 = smov 16  }
 0x179   :  { %1426 = dma.vmem_to_hbm [thread:$0]  %s1421_s2, 9728, %s2142_s3, [#allocation3], %s1701_s20, %s1701_s20, %s1702_s21  }
 0x17a   :  { %1696 = dma.done.wait [#allocation3], 9728  }
 0x17b   :  { %1697 = vsyncadd [#allocation3], 4294957568 }
 0x17c   :  { %1430 = vsyncpa [#allocation3], 1 }

</bundles_post_ra>
